<compile_context>
chip_gen: v6e
topology: v6e:2x2x1
jax: 0.10.0
libtpu: 0.0.40
codegen_flags: <defaults>
</compile_context>

<pallas_src>
import numpy as np

import jax
import jax.numpy as jnp
from jax.experimental import pallas as pl
from jax.experimental.pallas import tpu as pltpu

_LANES = 128


def _round_up(x, m):
    return ((x + m - 1) // m) * m


# ----------------------------------------------------------------------------
# Kernel A ("cross"): box1 tile on lanes  x  box2 rows on sublanes.
# ----------------------------------------------------------------------------
def _iou_cross_kernel(b1_ref, b2_ref, o_ref):
    # b1_ref : (1, 4, TP)  box1 coordinate planes [x, y, w, h], boxes on lanes
    # b2_ref : (1, Q, 4)   box2 rows (natural layout), boxes on sublanes
    # o_ref  : (1, Q, TP)  IoU(box2_q, box1_p)
    b1 = b1_ref[0]                      # (4, TP)
    x1 = b1[0:1]                        # (1, TP)
    y1 = b1[1:2]
    w1 = b1[2:3]
    h1 = b1[3:4]

    b2 = b2_ref[0]                      # (Q, 4)
    x2 = b2[:, 0:1]                     # (Q, 1)
    y2 = b2[:, 1:2]
    w2 = b2[:, 2:3]
    h2 = b2[:, 3:4]

    hw1 = w1 * 0.5
    hh1 = h1 * 0.5
    hw2 = w2 * 0.5
    hh2 = h2 * 0.5

    ix_min = jnp.maximum(x1 - hw1, x2 - hw2)    # (Q, TP)
    ix_max = jnp.minimum(x1 + hw1, x2 + hw2)
    iy_min = jnp.maximum(y1 - hh1, y2 - hh2)
    iy_max = jnp.minimum(y1 + hh1, y2 + hh2)

    iw = jnp.maximum(ix_max - ix_min, 0.0)
    ih = jnp.maximum(iy_max - iy_min, 0.0)

    inter = iw * ih
    union = w1 * h1 + w2 * h2 - inter
    o_ref[0] = inter / union


# ----------------------------------------------------------------------------
# Kernel B ("flat"): elementwise IoU over flattened, already-broadcast boxes.
# Used only when there is no exploitable cross/broadcast structure (e.g. equal
# shapes), in which case both operands are already ~output-sized.
# ----------------------------------------------------------------------------
def _iou_flat_kernel(b1_ref, b2_ref, o_ref):
    # b1_ref / b2_ref : (4, TR, 128) coordinate planes; o_ref : (TR, 128)
    x1 = b1_ref[0]
    y1 = b1_ref[1]
    w1 = b1_ref[2]
    h1 = b1_ref[3]
    x2 = b2_ref[0]
    y2 = b2_ref[1]
    w2 = b2_ref[2]
    h2 = b2_ref[3]

    hw1 = w1 * 0.5
    hh1 = h1 * 0.5
    hw2 = w2 * 0.5
    hh2 = h2 * 0.5

    ix_min = jnp.maximum(x1 - hw1, x2 - hw2)
    ix_max = jnp.minimum(x1 + hw1, x2 + hw2)
    iy_min = jnp.maximum(y1 - hh1, y2 - hh2)
    iy_max = jnp.minimum(y1 + hh1, y2 + hh2)

    iw = jnp.maximum(ix_max - ix_min, 0.0)
    ih = jnp.maximum(iy_max - iy_min, 0.0)

    inter = iw * ih
    union = w1 * h1 + w2 * h2 - inter
    o_ref[...] = inter / union


# ----------------------------------------------------------------------------
# Cross path: no broadcast materialisation at all.
# ----------------------------------------------------------------------------
def _iou_cross(b1, b2, lead, shared, b1only, b2only):
    rank = len(lead)
    S = int(np.prod([lead[i] for i in shared])) if shared else 1
    P = int(np.prod([lead[i] for i in b1only])) if b1only else 1
    Q = int(np.prod([lead[i] for i in b2only])) if b2only else 1

    # box1 -> (S, 4, P) coordinate planes at NATURAL size (one small copy).
    b1p = jnp.transpose(b1, tuple(shared) + tuple(b2only) + (rank,) + tuple(b1only))
    b1p = b1p.reshape(S, 4, P)
    # box2 -> (S, Q, 4) natural rows (tiny; effectively VMEM-resident per s).
    b2p = jnp.transpose(b2, tuple(shared) + tuple(b1only) + tuple(b2only) + (rank,))
    b2p = b2p.reshape(S, Q, 4)

    p_pad = _round_up(P, _LANES)
    if p_pad != P:
        # unit boxes in the (discarded) pad -> no 0/0 in the tail.
        b1p = jnp.pad(b1p, ((0, 0), (0, 0), (0, p_pad - P)), constant_values=1.0)

    # ~1 MiB f32 output blocks, lane-dense, at least 128 lanes.
    tp = max(_LANES, min(p_pad, ((1 << 18) // max(Q, 1)) // _LANES * _LANES))
    grid = (S, pl.cdiv(p_pad, tp))

    out = pl.pallas_call(
        _iou_cross_kernel,
        out_shape=jax.ShapeDtypeStruct((S, Q, p_pad), jnp.float32),
        grid=grid,
        in_specs=[
            pl.BlockSpec((1, 4, tp), lambda s, p: (s, 0, p)),
            pl.BlockSpec((1, Q, 4), lambda s, p: (s, 0, 0)),   # constant across p
        ],
        out_specs=pl.BlockSpec((1, Q, tp), lambda s, p: (s, 0, p)),
        compiler_params=pltpu.CompilerParams(
            dimension_semantics=("parallel", "parallel"),  # both TCs on v7x
            vmem_limit_bytes=32 * 1024 * 1024,
        ),
    )(b1p, b2p)

    if p_pad != P:
        out = out[:, :, :P]
    # Un-permute back to the torch lead order (skipped when already in order).
    perm = list(shared) + list(b2only) + list(b1only)
    out = out.reshape(tuple(lead[i] for i in perm))
    inv = [0] * rank
    for k, p_ in enumerate(perm):
        inv[p_] = k
    if inv != list(range(rank)):
        out = jnp.transpose(out, inv)
    return out


# ----------------------------------------------------------------------------
# Flat path: broadcast (a ~no-op here since shapes already match), flatten,
# lane-dense coordinate planes, cdiv grid with partial last block.
# ----------------------------------------------------------------------------
def _iou_flat(b1, b2, lead, m):
    rows = pl.cdiv(max(m, 1), _LANES)
    rows8 = _round_up(rows, 8)                      # pad only to sublane multiple
    # aim for ~8 grid steps (v7x megacore) before capping tiles at 1024 rows
    tr = min(1024, max(8, _round_up(pl.cdiv(rows8, 8), 8)))
    grid = (pl.cdiv(rows8, tr),)                    # partial last block allowed
    pad = rows8 * _LANES - m

    def to_planes(b):
        b = jnp.broadcast_to(b, tuple(lead) + (4,)).reshape(m, 4).T    # (4, m)
        if pad:
            b = jnp.pad(b, ((0, 0), (0, pad)), constant_values=1.0)
        return b.reshape(4, rows8, _LANES)

    out = pl.pallas_call(
        _iou_flat_kernel,
        out_shape=jax.ShapeDtypeStruct((rows8, _LANES), jnp.float32),
        grid=grid,
        in_specs=[
            pl.BlockSpec((4, tr, _LANES), lambda i: (0, i, 0)),
            pl.BlockSpec((4, tr, _LANES), lambda i: (0, i, 0)),
        ],
        out_specs=pl.BlockSpec((tr, _LANES), lambda i: (i, 0)),
        compiler_params=pltpu.CompilerParams(
            dimension_semantics=("parallel",),
            vmem_limit_bytes=32 * 1024 * 1024,
        ),
    )(to_planes(b1), to_planes(b2))

    out = out.reshape(rows8 * _LANES)
    if pad:
        out = out[:m]
    return out.reshape(tuple(lead))


# ----------------------------------------------------------------------------
# Public wrapper: matches torch Iou.forward (including broadcasting semantics).
# ----------------------------------------------------------------------------
def iou_pallas(box1, box2, *, min_elems_for_pallas=1 << 16):
    box1 = jnp.asarray(box1)
    box2 = jnp.asarray(box2)
    s1 = box1.shape[:-1]
    s2 = box2.shape[:-1]
    lead = jnp.broadcast_shapes(s1, s2)
    m = int(np.prod(lead)) if len(lead) else 1

    b1 = box1[..., :4].astype(jnp.float32)
    b2 = box2[..., :4].astype(jnp.float32)

    # Small problems: one fused XLA elementwise op beats pallas_call fixed cost.
    if m < min_elems_for_pallas:
        return iou_ref(b1, b2)

    rank = len(lead)
    s1p = (1,) * (rank - len(s1)) + tuple(s1)
    s2p = (1,) * (rank - len(s2)) + tuple(s2)
    b1 = b1.reshape(s1p + (4,))
    b2 = b2.reshape(s2p + (4,))

    # Classify lead axes by broadcast role.
    shared, b1only, b2only = [], [], []
    for i in range(rank):
        l, a, c = lead[i], s1p[i], s2p[i]
        if a == l and c == l:
            shared.append(i)
        elif c == 1:
            b1only.append(i)
        else:
            b2only.append(i)

    P = int(np.prod([lead[i] for i in b1only])) if b1only else 1
    Q = int(np.prod([lead[i] for i in b2only])) if b2only else 1

    # IoU is symmetric: keep the larger broadcast factor on the lane-tiled side.
    if Q > P:
        b1, b2 = b2, b1
        b1only, b2only = b2only, b1only
        P, Q = Q, P

    if Q >= 2 and P >= _LANES and Q <= 4096:
        return _iou_cross(b1, b2, lead, shared, b1only, b2only)
    # No exploitable cross structure (e.g. equal shapes, or degenerate sizes).
    return _iou_flat(b1, b2, lead, m)


# ----------------------------------------------------------------------------
# Pure-JAX reference (mirrors the PyTorch module line for line); also used as
# the small-problem fast path.
# ----------------------------------------------------------------------------
def iou_ref(box1, box2):
    b1_xy = box1[..., :2]
    b1_wh = box1[..., 2:4]
    b1_mins = b1_xy - b1_wh / 2.0
    b1_maxs = b1_xy + b1_wh / 2.0
    b2_xy = box2[..., :2]
    b2_wh = box2[..., 2:4]
    b2_mins = b2_xy - b2_wh / 2.0
    b2_maxs = b2_xy + b2_wh / 2.0
    i_mins = jnp.maximum(b1_mins, b2_mins)
    i_maxs = jnp.minimum(b1_maxs, b2_maxs)
    i_wh = jnp.maximum(i_maxs - i_mins, 0.0)
    i_area = i_wh[..., 0] * i_wh[..., 1]
    a1 = b1_wh[..., 0] * b1_wh[..., 1]
    a2 = b2_wh[..., 0] * b2_wh[..., 1]
    return i_area / (a1 + a2 - i_area)


# ----------------------------------------------------------------------------
if __name__ == "__main__":
    key = jax.random.PRNGKey(0)
    k1, k2, k3, k4 = jax.random.split(key, 4)

    # YOLO-style 6-D inputs exercising the broadcast path of the module.
    box1 = jax.random.uniform(k1, (2, 8, 8, 3, 1, 4), jnp.float32, 0.1, 0.9)
    box2 = jax.random.uniform(k2, (2, 1, 1, 1, 6, 4), jnp.float32, 0.1, 0.9)

    # Force the Pallas path even at this small test size (cross kernel).
    fwd = jax.jit(lambda a, b: iou_pallas(a, b, min_elems_for_pallas=0))
    out = jax.block_until_ready(fwd(box1, box2))
    assert out.shape == (2, 8, 8, 3, 6), out.shape
    assert bool(jnp.all(jnp.isfinite(out)))
    ref = iou_ref(box1.astype(jnp.float32), box2.astype(jnp.float32))
    np.testing.assert_allclose(np.asarray(out), np.asarray(ref),
                               rtol=1e-5, atol=1e-6)

    # Equal-shape inputs (no broadcast structure) exercise the flat Pallas path.
    a = jax.random.uniform(k3, (2, 4, 4, 3, 6, 4), jnp.float32, 0.1, 0.9)
    b = jax.random.uniform(k4, (2, 4, 4, 3, 6, 4), jnp.float32, 0.1, 0.9)
    out2 = jax.block_until_ready(fwd(a, b))
    np.testing.assert_allclose(np.asarray(out2), np.asarray(iou_ref(a, b)),
                               rtol=1e-5, atol=1e-6)

    # Default routing: small problems take the fused pure-JAX fast path.
    out3 = jax.block_until_ready(jax.jit(iou_pallas)(box1, box2))
    np.testing.assert_allclose(np.asarray(out3), np.asarray(ref),
                               rtol=1e-5, atol=1e-6)

    print("KERNEL_OK")
</pallas_src>

<mosaic_0001>
module attributes {stable_mosaic.version = 11 : i64} {
  func.func @_iou_cross_kernel(%arg0: i32, %arg1: i32, %arg2: memref<1x4x256xf32, #tpu.memory_space<vmem>>, %arg3: memref<1x6x4xf32, #tpu.memory_space<vmem>>, %arg4: memref<1x6x256xf32, #tpu.memory_space<vmem>>) attributes {dimension_semantics = [#tpu.dimension_semantics<parallel>, #tpu.dimension_semantics<parallel>], iteration_bounds = array<i64: 2, 1>, scalar_prefetch = 0 : i64, scratch_operands = 0 : i64, tpu.core_type = #tpu.core_type<tc>, window_params = [{transform_indices = @transform_0, window_bounds = array<i64: 1, 4, 256>}, {transform_indices = @transform_1, window_bounds = array<i64: 1, 6, 4>}, {transform_indices = @transform_2, window_bounds = array<i64: 1, 6, 256>}]} {
    %c0 = arith.constant 0 : index
    %c0_0 = arith.constant 0 : index
    %c0_1 = arith.constant 0 : index
    %0 = vector.load %arg2[%c0, %c0_0, %c0_1] : memref<1x4x256xf32, #tpu.memory_space<vmem>>, vector<1x4x256xf32>
    %1 = vector.shape_cast %0 : vector<1x4x256xf32> to vector<4x256xf32>
    %2 = vector.extract_strided_slice %1 {offsets = [0, 0], sizes = [1, 256], strides = [1, 1]} : vector<4x256xf32> to vector<1x256xf32>
    %3 = vector.extract_strided_slice %1 {offsets = [1, 0], sizes = [1, 256], strides = [1, 1]} : vector<4x256xf32> to vector<1x256xf32>
    %4 = vector.extract_strided_slice %1 {offsets = [2, 0], sizes = [1, 256], strides = [1, 1]} : vector<4x256xf32> to vector<1x256xf32>
    %5 = vector.extract_strided_slice %1 {offsets = [3, 0], sizes = [1, 256], strides = [1, 1]} : vector<4x256xf32> to vector<1x256xf32>
    %c0_2 = arith.constant 0 : index
    %c0_3 = arith.constant 0 : index
    %c0_4 = arith.constant 0 : index
    %6 = vector.load %arg3[%c0_2, %c0_3, %c0_4] : memref<1x6x4xf32, #tpu.memory_space<vmem>>, vector<1x6x4xf32>
    %7 = vector.shape_cast %6 : vector<1x6x4xf32> to vector<6x4xf32>
    %8 = vector.extract_strided_slice %7 {offsets = [0, 0], sizes = [6, 1], strides = [1, 1]} : vector<6x4xf32> to vector<6x1xf32>
    %9 = vector.extract_strided_slice %7 {offsets = [0, 1], sizes = [6, 1], strides = [1, 1]} : vector<6x4xf32> to vector<6x1xf32>
    %10 = vector.extract_strided_slice %7 {offsets = [0, 2], sizes = [6, 1], strides = [1, 1]} : vector<6x4xf32> to vector<6x1xf32>
    %11 = vector.extract_strided_slice %7 {offsets = [0, 3], sizes = [6, 1], strides = [1, 1]} : vector<6x4xf32> to vector<6x1xf32>
    %cst = arith.constant 5.000000e-01 : f32
    %12 = vector.broadcast %cst : f32 to vector<1x256xf32>
    %13 = arith.mulf %4, %12 : vector<1x256xf32>
    %cst_5 = arith.constant 5.000000e-01 : f32
    %14 = vector.broadcast %cst_5 : f32 to vector<1x256xf32>
    %15 = arith.mulf %5, %14 : vector<1x256xf32>
    %cst_6 = arith.constant 5.000000e-01 : f32
    %16 = vector.broadcast %cst_6 : f32 to vector<6x1xf32>
    %17 = arith.mulf %10, %16 : vector<6x1xf32>
    %cst_7 = arith.constant 5.000000e-01 : f32
    %18 = vector.broadcast %cst_7 : f32 to vector<6x1xf32>
    %19 = arith.mulf %11, %18 : vector<6x1xf32>
    %20 = arith.subf %2, %13 : vector<1x256xf32>
    %21 = arith.subf %8, %17 : vector<6x1xf32>
    %22 = vector.broadcast %20 : vector<1x256xf32> to vector<6x256xf32>
    %23 = vector.broadcast %21 : vector<6x1xf32> to vector<6x256xf32>
    %24 = arith.maximumf %22, %23 : vector<6x256xf32>
    %25 = arith.addf %2, %13 : vector<1x256xf32>
    %26 = arith.addf %8, %17 : vector<6x1xf32>
    %27 = vector.broadcast %25 : vector<1x256xf32> to vector<6x256xf32>
    %28 = vector.broadcast %26 : vector<6x1xf32> to vector<6x256xf32>
    %29 = arith.minimumf %27, %28 : vector<6x256xf32>
    %30 = arith.subf %3, %15 : vector<1x256xf32>
    %31 = arith.subf %9, %19 : vector<6x1xf32>
    %32 = vector.broadcast %30 : vector<1x256xf32> to vector<6x256xf32>
    %33 = vector.broadcast %31 : vector<6x1xf32> to vector<6x256xf32>
    %34 = arith.maximumf %32, %33 : vector<6x256xf32>
    %35 = arith.addf %3, %15 : vector<1x256xf32>
    %36 = arith.addf %9, %19 : vector<6x1xf32>
    %37 = vector.broadcast %35 : vector<1x256xf32> to vector<6x256xf32>
    %38 = vector.broadcast %36 : vector<6x1xf32> to vector<6x256xf32>
    %39 = arith.minimumf %37, %38 : vector<6x256xf32>
    %40 = arith.subf %29, %24 : vector<6x256xf32>
    %cst_8 = arith.constant 0.000000e+00 : f32
    %41 = vector.broadcast %cst_8 : f32 to vector<6x256xf32>
    %42 = arith.maximumf %40, %41 : vector<6x256xf32>
    %43 = arith.subf %39, %34 : vector<6x256xf32>
    %cst_9 = arith.constant 0.000000e+00 : f32
    %44 = vector.broadcast %cst_9 : f32 to vector<6x256xf32>
    %45 = arith.maximumf %43, %44 : vector<6x256xf32>
    %46 = arith.mulf %42, %45 : vector<6x256xf32>
    %47 = arith.mulf %4, %5 : vector<1x256xf32>
    %48 = arith.mulf %10, %11 : vector<6x1xf32>
    %49 = vector.broadcast %47 : vector<1x256xf32> to vector<6x256xf32>
    %50 = vector.broadcast %48 : vector<6x1xf32> to vector<6x256xf32>
    %51 = arith.addf %49, %50 : vector<6x256xf32>
    %52 = arith.subf %51, %46 : vector<6x256xf32>
    %53 = arith.divf %46, %52 : vector<6x256xf32>
    %c0_10 = arith.constant 0 : index
    %c0_11 = arith.constant 0 : index
    %c0_12 = arith.constant 0 : index
    %54 = vector.load %arg4[%c0_10, %c0_11, %c0_12] : memref<1x6x256xf32, #tpu.memory_space<vmem>>, vector<1x6x256xf32>
    %55 = vector.shape_cast %54 : vector<1x6x256xf32> to vector<6x256xf32>
    %56 = vector.shape_cast %53 : vector<6x256xf32> to vector<1x6x256xf32>
    tpu.vector_store %arg4[%c0_10, %c0_11, %c0_12], %56 {strides = array<i32>} : memref<1x6x256xf32, #tpu.memory_space<vmem>>, vector<1x6x256xf32>,
    return
  }
  func.func @transform_0(%arg0: i32, %arg1: i32) -> (i32, i32, i32) {
    %c0_i32 = arith.constant 0 : i32
    %c0_i32_0 = arith.constant 0 : i32
    return %arg0, %c0_i32, %arg1 : i32, i32, i32
  }
  func.func @transform_1(%arg0: i32, %arg1: i32) -> (i32, i32, i32) {
    %c0_i32 = arith.constant 0 : i32
    %c0_i32_0 = arith.constant 0 : i32
    %c0_i32_1 = arith.constant 0 : i32
    return %arg0, %c0_i32, %c0_i32_0 : i32, i32, i32
  }
  func.func @transform_2(%arg0: i32, %arg1: i32) -> (i32, i32, i32) {
    %c0_i32 = arith.constant 0 : i32
    %c0_i32_0 = arith.constant 0 : i32
    return %arg0, %c0_i32, %arg1 : i32, i32, i32
  }
}

</mosaic_0001>

<bundles_post_ra>
// kernel: _lambda_.1
= control target key start
LH: loop header
LB: loop body
LE: loop exit
PB: predicated region body
PF: predicated region fallthrough
CT: control target
= control target key end

     0   :  { %s566_s9 = smov 0   ;;  %s568_s10 = smov 0   ;;  %s606_s0 = inlined_call_operand.vmem [shape: f32[2,4,256], index: 0, kind: input, shape index: {}]   ;;  %s607_s1 = inlined_call_operand.vmem [shape: f32[2,6,4], index: 1, kind: input, shape index: {}]   ;;  %s608_s2 = inlined_call_operand.vmem [shape: f32[2,6,256], index: 2, kind: output, shape index: {}]  }
   0x1   :  { %s570_s11 = smov 0  }
   0x2 LB: > { %s24_s12 = sadd.s32 1, %s540_s10  ;;  %p473_p0 = scmp.ge.s32.totalorder %s544_s11, 1  ;;  %s544_s11 = sphi %s570_s11, %s12_s11   ;;  %s540_s10 = sphi %s568_s10, %s610_s10   ;;  %s536_s9 = sphi %s566_s9, %s609_s9  }
   0x3   : > { %p26_p1 = scmp.ge.s32.totalorder %s24_s12, 2  ;;  %p142_p2 = scmp.lt.s32.totalorder %s544_s11, 3 }
   0x5   : > { %s612_s12 = smov (%p26_p1, %s24_s12), 0  ;;  %p143_p3 = pnand %p473_p0, %p142_p2 }
   0x6   : > { %p177_p4 = scmp.lt.s32.totalorder (!%p143_p3), %s536_s9, 1  ;;  %s548_s17 = smov (!%p143_p3), 126  }
   0x7   : > { %146 = sbr.rel (%p143_p3) target bundleno = 296 (0x128), region = 28  ;;  %s549_s18 = smov (!%p143_p3), 127  }
   0xc   : > { %v546_v0 = vmov 1   ;;  %v547_v1 = vmov 0   ;;  %s614_s9 = smov (!%p177_p4, %s536_s9), 1  ;;  %v550_v7 = vmov 2   ;;  %v215_v12 = vlaneseq }
   0xd   : > { %514 = vset.pattern.permute.xlu0 %v546_v0  ;;  %513 = vset.pattern.permute.xlu1 %v547_v1  ;;  %s482_s13 = sshll.u32 %s614_s9, 3  ;;  %s483_s22 = sshll.u32 %s614_s9, 4 }
   0xe   : > { %s189_s16 = scalar_lea.vmem %s607_s1, %s482_s13  ;;  %s184_s21 = scalar_lea.vmem %s606_s0, %s482_s13  ;;  %v216_v14 = vshrl.u32 %v215_v12, 7 }
   0xf   : > { %v201_v2 = vld [vmem:[%s189_s16] sm:$0x3f]  ;;  %s198_s25 = scalar_lea.vmem %s608_s2, %s483_s22 }
  0x10   : > { %v203_v3 = vmul.f32 0.5, %v201_v2  ;;  %v200_v10 = vld [vmem:[%s184_s21] sm:$0xff]  ;;  %v217_v17 = vsub.s32 0, %v216_v14  ;;  %v221_v18 = vsub.s32 4, %v216_v14  ;;  %v270_v20 = vsub.s32 1, %v216_v14 }
  0x11   : > { %v202_v11 = vmul.f32 0.5, %v200_v10  ;;  %v274_v21 = vsub.s32 5, %v216_v14  ;;  %v479_v24 = vrot.slane %v200_v10, 9  ;;  %v339_v34 = vsub.s32 2, %v216_v14 }
  0x12   : > { %210 = vrot.lane.b32.xlu0 %v203_v3, %s548_s17  ;;  %v343_v35 = vsub.s32 6, %v216_v14 }
  0x13   : > { %v205_v13 = vrot.slane %v202_v11, 6  ;;  %v330_v36 = vmul.f32 %v479_v24, %v200_v10 }
  0x15   : > { %v206_v15 = vrot.slane %v205_v13, 4  ;;  %v340_v47 = vrot.slane %v330_v36, %v339_v34  ;;  %v344_v48 = vrot.slane %v330_v36, %v343_v35 }
  0x16   : > { %332 = vrot.lane.b32.xlu0 %v201_v2, %s549_s18 }
  0x17   : > { %v240_v16 = vadd.f32 %v206_v15, %v200_v10  ;;  %v208_v19 = vsub.f32 %v200_v10, %v206_v15  ;;  %v350_v58 = vrot.slane %v340_v47, %v339_v34  ;;  %v354_v59 = vrot.slane %v344_v48, %v339_v34 }
  0x19   : > { %v246_v22 = vrot.slane %v240_v16, %v217_v17  ;;  %v250_v23 = vrot.slane %v240_v16, %v221_v18  ;;  %v218_v26 = vrot.slane %v208_v19, %v217_v17  ;;  %v222_v27 = vrot.slane %v208_v19, %v221_v18 }
  0x1a   : > { %v271_v28 = vrot.slane %v208_v19, %v270_v20  ;;  %v275_v29 = vrot.slane %v208_v19, %v274_v21  ;;  %v295_v32 = vrot.slane %v240_v16, %v270_v20  ;;  %v299_v33 = vrot.slane %v240_v16, %v274_v21 }
  0x1b   : > { %v256_v30 = vrot.slane %v246_v22, %v217_v17  ;;  %v260_v31 = vrot.slane %v250_v23, %v217_v17  ;;  %v228_v37 = vrot.slane %v218_v26, %v217_v17  ;;  %v232_v38 = vrot.slane %v222_v27, %v217_v17 }
  0x1c   : > { %v281_v40 = vrot.slane %v271_v28, %v270_v20  ;;  %v285_v41 = vrot.slane %v275_v29, %v270_v20  ;;  %v305_v45 = vrot.slane %v295_v32, %v270_v20  ;;  %v309_v46 = vrot.slane %v299_v33, %v270_v20 }
  0x84   : > { %v211_v4 = vpop.permute.xlu0 %210 }
  0x85   : > { %v213_v5 = vsub.f32 %v201_v2, %v211_v4  ;;  %v241_v6 = vadd.f32 %v211_v4, %v201_v2 }
  0x87   : > { %287 = vperm.xlu0 %514, %v213_v5   ;;  %235 = vperm.xlu1 %513, %v213_v5  }
  0x88   : > { %v333_v8 = vpop.permute.xlu0 %332 }
  0x89   : > { %v335_v9 = vmul.f32 %v333_v8, %v201_v2 }
  0x8b   : > { %263 = vperm.xlu1 %513, %v241_v6   ;;  %517 = vset.pattern.permute.xlu0 %v550_v7 }
  0x8f   : > { %515 = vset.pattern.permute.xlu1 %v546_v0 }
  0x90   : > { %311 = vperm.xlu1 %515, %v241_v6  }
  0x94   : > { %516 = vset.pattern.permute.xlu1 %v550_v7 }
  0x95   : > { %357 = vperm.xlu1 %516, %v335_v9  }
 0x102   : > { %v236_v25 = vpop.permute.xlu1 %235  ;;  %v288_v42 = vpop.permute.xlu0 %287 }
 0x103   : > { %v238_v49 = vmax.f32 %v228_v37, %v236_v25  ;;  %v239_v50 = vmax.f32 %v232_v38, %v236_v25  ;;  %v290_v51 = vmax.f32 %v281_v40, %v288_v42  ;;  %v291_v52 = vmax.f32 %v285_v41, %v288_v42 }
 0x106   : > { %v264_v39 = vpop.permute.xlu1 %263 }
 0x107   : > { %v266_v43 = vmin.f32 %v256_v30, %v264_v39  ;;  %v267_v44 = vmin.f32 %v260_v31, %v264_v39 }
 0x109   : > { %v316_v54 = vsub.f32 %v266_v43, %v238_v49  ;;  %v317_v55 = vsub.f32 %v267_v44, %v239_v50 }
 0x10b   : > { %v312_v53 = vpop.permute.xlu1 %311  ;;  %v318_v62 = vmax.f32 %v316_v54, 0.0  ;;  %v319_v63 = vmax.f32 %v317_v55, 0.0 }
 0x10c   : > { %v314_v56 = vmin.f32 %v305_v45, %v312_v53  ;;  %v315_v57 = vmin.f32 %v309_v46, %v312_v53 }
 0x10e   : > { %v320_v60 = vsub.f32 %v314_v56, %v290_v51  ;;  %v321_v61 = vsub.f32 %v315_v57, %v291_v52 }
 0x110   : > { %v322_v0 = vmax.f32 %v320_v60, 0.0  ;;  %v323_v1 = vmax.f32 %v321_v61, 0.0  ;;  %v358_v2 = vpop.permute.xlu1 %357 }
 0x111   : > { %v360_v3 = vadd.f32 %v358_v2, %v350_v58  ;;  %v361_v4 = vadd.f32 %v358_v2, %v354_v59 }
 0x112   : > { %v324_v5 = vmul.f32 %v322_v0, %v318_v62  ;;  %v325_v6 = vmul.f32 %v323_v1, %v319_v63 }
 0x114   : > { %v362_v7 = vsub.f32 %v360_v3, %v324_v5  ;;  %v363_v8 = vsub.f32 %v361_v4, %v325_v6 }
 0x116   : > { %518 = vrcp.f32 %v362_v7 }
 0x117   : > { %520 = vrcp.f32 %v363_v8 }
 0x123   : > { %v519_v9 = vpop.eup %518 }
 0x124   : > { %v521_v10 = vpop.eup %520  ;;  %v365_v11 = vmul.f32 %v519_v9, %v324_v5 }
 0x125   : > { %v367_v12 = vmul.f32 %v521_v10, %v325_v6 }
 0x126   : > { %368 = vst [vmem:[%s198_s25] sm:$0x3f] %v365_v11 }
 0x127   : > { %369 = vst [vmem:[%s198_s25 + $0x8] sm:$0x3f] %v367_v12 }
 0x128 PF: > { %s12_s11 = sadd.s32 1, %s544_s11   ;;  %s609_s9 = smov %s540_s10 }
 0x129   : > { %p9_p5 = scmp.ge.s32.totalorder %s12_s11, 4   ;;  %s610_s10 = smov %s612_s12 }
 0x12b   :  { %11 = sbr.rel (!%p9_p5) target bundleno = 2 (0x2), region = 61 }

</bundles_post_ra>
